<compile_context>
chip_gen: v5e
topology: v5e:2x2
jax: 0.10.0
libtpu: 0.0.40
codegen_flags: <defaults>
</compile_context>

<pallas_src>
import functools

import jax
import jax.numpy as jnp
from jax import lax
from jax.experimental import pallas as pl
from jax.experimental.pallas import tpu as pltpu

_EPS = 1e-5                       # nn.LayerNorm default
_VMEM_LIMIT = 32 * 1024 * 1024    # explicit scoped-VMEM budget (safe on v5e/v6e/v7x)


def _rep(shape):
    """Whole-array block, replicated across the grid (weights / biases / LN params)."""
    return pl.BlockSpec(shape, lambda *_: (0,) * len(shape))


def _row_tile(rows):
    """Row tile: 8-aligned, <=512, and >=2 grid steps when possible (v7x: 2 TensorCores)."""
    if rows >= 1024:
        return 512
    if rows >= 16:
        return max(8, (rows // 2) // 8 * 8)
    return rows


def _layer_norm(v, gamma, beta, eps):
    mean = jnp.mean(v, axis=-1, keepdims=True)
    var = jnp.mean((v - mean) ** 2, axis=-1, keepdims=True)
    return (v - mean) * lax.rsqrt(var + eps) * gamma + beta


# ----------------------------------------------------------------------------
# Kernel 1: fused Q|K|V projection.  grid = (ceil(R/tm),), rows of the flattened (B*L, D) x.
# Emits Q (pre-scaled by 1/sqrt(dh)), K, V as three separate bf16 (R, D) outputs.
# ----------------------------------------------------------------------------
def _qkv_kernel(x_ref, w_ref, b_ref, q_ref, k_ref, v_ref, *, d, scale):
    acc = jnp.dot(x_ref[...].astype(w_ref.dtype), w_ref[...],
                  preferred_element_type=jnp.float32) + b_ref[...]
    q_ref[...] = (acc[:, :d] * scale).astype(q_ref.dtype)   # scale folded into Q (free)
    k_ref[...] = acc[:, d:2 * d].astype(k_ref.dtype)
    v_ref[...] = acc[:, 2 * d:].astype(v_ref.dtype)


# ----------------------------------------------------------------------------
# Kernel 2: scaled dot-product attention, heads batched in-kernel, tiled over query blocks.
# grid = (B, ceil(L/tq));  K/V stay resident across the query-tile axis.
# ----------------------------------------------------------------------------
def _attn_kernel(q_ref, k_ref, v_ref, o_ref):
    q = q_ref[...]                                            # (H, tq, dh) bf16, pre-scaled
    k = k_ref[...]                                            # (H, L, dh)  bf16
    v = v_ref[...]                                            # (H, L, dh)  bf16
    # scores = Q @ K^T per head, contracting last dims (no materialized transpose).
    s = lax.dot_general(q, k, dimension_numbers=(((2,), (2,)), ((0,), (0,))),
                        preferred_element_type=jnp.float32)   # (H, tq, L) f32
    s = s - jnp.max(s, axis=-1, keepdims=True)                # stabilized softmax
    p = jnp.exp(s)
    p = p / jnp.sum(p, axis=-1, keepdims=True)                # exact divide (cheap, robust)
    o_ref[...] = lax.dot_general(p.astype(v.dtype), v,
                                 dimension_numbers=(((2,), (1,)), ((0,), (0,))),
                                 preferred_element_type=jnp.float32).astype(o_ref.dtype)


# ----------------------------------------------------------------------------
# Kernel 3: out-proj + residual + LN1 + FFN + residual + LN2.  grid = (ceil(R/tm),)
# ----------------------------------------------------------------------------
def _proj_ffn_kernel(ctx_ref, x_ref, wo_ref, bo_ref, g1_ref, be1_ref,
                     w1_ref, b1_ref, w2_ref, b2_ref, g2_ref, be2_ref,
                     o_ref, *, eps):
    h = (jnp.dot(ctx_ref[...], wo_ref[...], preferred_element_type=jnp.float32)
         + bo_ref[...])
    h = _layer_norm(h + x_ref[...], g1_ref[...], be1_ref[...], eps)          # MHA output (f32)
    f = jnp.dot(h.astype(w1_ref.dtype), w1_ref[...],
                preferred_element_type=jnp.float32) + b1_ref[...]
    f = jnp.maximum(f, 0.0)
    f = jnp.dot(f.astype(w2_ref.dtype), w2_ref[...],
                preferred_element_type=jnp.float32) + b2_ref[...] + h
    o_ref[...] = _layer_norm(f, g2_ref[...], be2_ref[...], eps).astype(o_ref.dtype)


# ----------------------------------------------------------------------------
# Param prep (hoisted out of the forward path): fuse QKV weights, cast weights to bf16.
# ----------------------------------------------------------------------------
def prepare_params(params):
    bf = lambda a: a.astype(jnp.bfloat16)
    return {
        "w_qkv": bf(jnp.concatenate([params["wq"], params["wk"], params["wv"]], axis=1)),
        "b_qkv": jnp.concatenate([params["bq"], params["bk"], params["bv"]], axis=1),  # f32
        "wo": bf(params["wo"]), "bo": params["bo"],
        "w1": bf(params["w1"]), "b1": params["b1"],
        "w2": bf(params["w2"]), "b2": params["b2"],
        "ln1_g": params["ln1_g"], "ln1_b": params["ln1_b"],
        "ln2_g": params["ln2_g"], "ln2_b": params["ln2_b"],
    }


# ----------------------------------------------------------------------------
# Wrapper
# ----------------------------------------------------------------------------
def encoder_forward(x, prep, *, num_head):
    B, L, D = x.shape
    H = num_head
    dh = D // H
    hidden = prep["w1"].shape[1]
    R = B * L

    tm = _row_tile(R)
    grid_rows = (pl.cdiv(R, tm),)
    cp_rows = pltpu.CompilerParams(dimension_semantics=("parallel",),
                                   vmem_limit_bytes=_VMEM_LIMIT)

    x2 = x.reshape(R, D)                                      # f32 (kept f32 for residual/LN)

    # ---- fused Q/K/V projection: three separate lane-dense bf16 outputs -----
    row_spec = pl.BlockSpec((tm, D), lambda i: (i, 0))
    q, k, v = pl.pallas_call(
        functools.partial(_qkv_kernel, d=D, scale=float(dh) ** (-0.5)),
        out_shape=(jax.ShapeDtypeStruct((R, D), jnp.bfloat16),
                   jax.ShapeDtypeStruct((R, D), jnp.bfloat16),
                   jax.ShapeDtypeStruct((R, D), jnp.bfloat16)),
        grid_spec=pltpu.PrefetchScalarGridSpec(
            num_scalar_prefetch=0, grid=grid_rows,
            in_specs=[row_spec, _rep((D, 3 * D)), _rep((1, 3 * D))],
            out_specs=[row_spec, row_spec, row_spec]),
        compiler_params=cp_rows,
    )(x2, prep["w_qkv"], prep["b_qkv"])

    # ---- PyTorch's .view(B*H, -1, dh): plain row-major reshape (free, no copy) ----
    Qh = q.reshape(B * H, L, dh)
    Kh = k.reshape(B * H, L, dh)
    Vh = v.reshape(B * H, L, dh)

    # ---- attention: grid over (batch, query tiles); heads batched in-kernel ----
    tq = L if L <= 128 else 128
    cp_attn = pltpu.CompilerParams(dimension_semantics=("parallel", "parallel"),
                                   vmem_limit_bytes=_VMEM_LIMIT)
    ctx = pl.pallas_call(
        _attn_kernel,
        out_shape=jax.ShapeDtypeStruct((B * H, L, dh), jnp.bfloat16),
        grid_spec=pltpu.PrefetchScalarGridSpec(
            num_scalar_prefetch=0, grid=(B, pl.cdiv(L, tq)),
            in_specs=[pl.BlockSpec((H, tq, dh), lambda b, qi: (b, qi, 0)),   # Q tile
                      pl.BlockSpec((H, L, dh), lambda b, qi: (b, 0, 0)),     # K resident
                      pl.BlockSpec((H, L, dh), lambda b, qi: (b, 0, 0))],    # V resident
            out_specs=pl.BlockSpec((H, tq, dh), lambda b, qi: (b, qi, 0))),
        compiler_params=cp_attn,
    )(Qh, Kh, Vh)

    ctx2 = ctx.reshape(R, D)     # context.view(batch, -1, H*dh), row-flattened (free reshape)

    # ---- out-proj + LN1 + FFN + LN2, fully fused ------------------------------
    out = pl.pallas_call(
        functools.partial(_proj_ffn_kernel, eps=_EPS),
        out_shape=jax.ShapeDtypeStruct((R, D), jnp.float32),
        grid_spec=pltpu.PrefetchScalarGridSpec(
            num_scalar_prefetch=0, grid=grid_rows,
            in_specs=[row_spec,                                # ctx (bf16)
                      row_spec,                                # residual x (f32)
                      _rep((D, D)), _rep((1, D)),              # Wo, bo
                      _rep((1, D)), _rep((1, D)),              # LN1 gamma, beta
                      _rep((D, hidden)), _rep((1, hidden)),    # W1, b1
                      _rep((hidden, D)), _rep((1, D)),         # W2, b2
                      _rep((1, D)), _rep((1, D))],             # LN2 gamma, beta
            out_specs=row_spec),
        compiler_params=cp_rows,
    )(ctx2, x2, prep["wo"], prep["bo"], prep["ln1_g"], prep["ln1_b"],
      prep["w1"], prep["b1"], prep["w2"], prep["b2"],
      prep["ln2_g"], prep["ln2_b"])

    return out.reshape(B, L, D)


# ----------------------------------------------------------------------------
# Pure-JAX f32 reference (mirrors the PyTorch forward exactly) for correctness check
# ----------------------------------------------------------------------------
def encoder_reference(x, params, *, num_head):
    B, L, D = x.shape
    H = num_head
    dh = D // H
    eps = _EPS

    def ln(v, g, b):
        m = jnp.mean(v, axis=-1, keepdims=True)
        var = jnp.mean((v - m) ** 2, axis=-1, keepdims=True)
        return (v - m) / jnp.sqrt(var + eps) * g + b

    Q = x @ params["wq"] + params["bq"]
    K = x @ params["wk"] + params["bk"]
    V = x @ params["wv"] + params["bv"]
    Qh = Q.reshape(B * H, L, dh)
    Kh = K.reshape(B * H, L, dh)
    Vh = V.reshape(B * H, L, dh)
    scale = float(dh) ** (-0.5)
    att = jnp.einsum("bqd,bkd->bqk", Qh, Kh) * scale
    att = jax.nn.softmax(att, axis=-1)
    ctx = jnp.einsum("bqk,bkd->bqd", att, Vh).reshape(B, L, D)
    out = ctx @ params["wo"] + params["bo"] + x
    out = ln(out, params["ln1_g"], params["ln1_b"])
    h = jax.nn.relu(out @ params["w1"] + params["b1"])
    out2 = h @ params["w2"] + params["b2"] + out
    return ln(out2, params["ln2_g"], params["ln2_b"])


# ----------------------------------------------------------------------------
if __name__ == "__main__":
    # small shapes consistent with the module
    B, L, D, H, hidden = 2, 8, 32, 4, 64

    key = jax.random.PRNGKey(0)
    ks = jax.random.split(key, 12)
    init = lambda k, shape, fan_in: (jax.random.normal(k, shape, jnp.float32)
                                     * (1.0 / jnp.sqrt(fan_in)))
    # Linear weights stored already transposed to (in, out): y = x @ W + b
    params = {
        "wq": init(ks[0], (D, D), D), "bq": init(ks[1], (1, D), D),
        "wk": init(ks[2], (D, D), D), "bk": init(ks[3], (1, D), D),
        "wv": init(ks[4], (D, D), D), "bv": init(ks[5], (1, D), D),
        "wo": init(ks[6], (D, D), D), "bo": init(ks[7], (1, D), D),
        "w1": init(ks[8], (D, hidden), D), "b1": init(ks[9], (1, hidden), D),
        "w2": init(ks[10], (hidden, D), hidden), "b2": init(ks[11], (1, D), hidden),
        "ln1_g": jnp.ones((1, D), jnp.float32), "ln1_b": jnp.zeros((1, D), jnp.float32),
        "ln2_g": jnp.ones((1, D), jnp.float32), "ln2_b": jnp.zeros((1, D), jnp.float32),
    }

    x = jax.random.normal(jax.random.PRNGKey(42), (B, L, D), jnp.float32)

    prep = prepare_params(params)               # hoisted: fused QKV weight + bf16 casts
    out = encoder_forward(x, prep, num_head=H)
    out = jax.block_until_ready(out)

    ref = encoder_reference(x, params, num_head=H)
    assert out.shape == (B, L, D)
    # Kernel matmuls run with bf16 operands (f32 accumulation) and bf16 inter-kernel
    # activations; the reference is pure f32, so tolerance is bf16-grade.
    assert jnp.allclose(out, ref, atol=5e-2, rtol=5e-2), "mismatch vs reference"

    print("KERNEL_OK")
</pallas_src>

<mosaic_0001>
module attributes {stable_mosaic.version = 11 : i64} {
  func.func @_qkv_kernel(%arg0: i32, %arg1: memref<8x32xf32, #tpu.memory_space<vmem>>, %arg2: memref<32x96xbf16, #tpu.memory_space<vmem>>, %arg3: memref<1x96xf32, #tpu.memory_space<vmem>>, %arg4: memref<8x32xbf16, #tpu.memory_space<vmem>>, %arg5: memref<8x32xbf16, #tpu.memory_space<vmem>>, %arg6: memref<8x32xbf16, #tpu.memory_space<vmem>>) attributes {dimension_semantics = [#tpu.dimension_semantics<parallel>], iteration_bounds = array<i64: 2>, scalar_prefetch = 0 : i64, scratch_operands = 0 : i64, tpu.core_type = #tpu.core_type<tc>, window_params = [{transform_indices = @transform_0, window_bounds = array<i64: 8, 32>}, {pipeline_mode = #tpu.pipeline_mode<synchronous>, transform_indices = @transform_1, window_bounds = array<i64: 32, 96>}, {pipeline_mode = #tpu.pipeline_mode<synchronous>, transform_indices = @transform_2, window_bounds = array<i64: 1, 96>}, {transform_indices = @transform_3, window_bounds = array<i64: 8, 32>}, {transform_indices = @transform_4, window_bounds = array<i64: 8, 32>}, {transform_indices = @transform_5, window_bounds = array<i64: 8, 32>}]} {
    %c0 = arith.constant 0 : index
    %c0_0 = arith.constant 0 : index
    %0 = vector.load %arg1[%c0, %c0_0] : memref<8x32xf32, #tpu.memory_space<vmem>>, vector<8x32xf32>
    %1 = arith.truncf %0 : vector<8x32xf32> to vector<8x32xbf16>
    %c0_1 = arith.constant 0 : index
    %c0_2 = arith.constant 0 : index
    %2 = vector.load %arg2[%c0_1, %c0_2] : memref<32x96xbf16, #tpu.memory_space<vmem>>, vector<32x96xbf16>
    %cst = arith.constant dense<0.000000e+00> : vector<8x96xf32>
    %3 = tpu.matmul %1, %2, %cst {dimension_numbers = #tpu.dot_dimension_numbers<[1], [0], [0], [1], [0, 0, 1, 1], [], []>} : vector<8x32xbf16>, vector<32x96xbf16>, vector<8x96xf32> -> vector<8x96xf32>
    %c0_3 = arith.constant 0 : index
    %c0_4 = arith.constant 0 : index
    %4 = vector.load %arg3[%c0_3, %c0_4] : memref<1x96xf32, #tpu.memory_space<vmem>>, vector<1x96xf32>
    %5 = vector.broadcast %4 : vector<1x96xf32> to vector<8x96xf32>
    %6 = arith.addf %3, %5 : vector<8x96xf32>
    %7 = vector.extract_strided_slice %6 {offsets = [0, 0], sizes = [8, 32], strides = [1, 1]} : vector<8x96xf32> to vector<8x32xf32>
    %cst_5 = arith.constant 0.353553385 : f32
    %8 = vector.broadcast %cst_5 : f32 to vector<8x32xf32>
    %9 = arith.mulf %7, %8 : vector<8x32xf32>
    %10 = arith.truncf %9 : vector<8x32xf32> to vector<8x32xbf16>
    %c0_6 = arith.constant 0 : index
    %c0_7 = arith.constant 0 : index
    %11 = vector.load %arg4[%c0_6, %c0_7] : memref<8x32xbf16, #tpu.memory_space<vmem>>, vector<8x32xbf16>
    tpu.vector_store %arg4[%c0_6, %c0_7], %10 {strides = array<i32>} : memref<8x32xbf16, #tpu.memory_space<vmem>>, vector<8x32xbf16>,
    %12 = vector.extract_strided_slice %6 {offsets = [0, 32], sizes = [8, 32], strides = [1, 1]} : vector<8x96xf32> to vector<8x32xf32>
    %13 = arith.truncf %12 : vector<8x32xf32> to vector<8x32xbf16>
    %c0_8 = arith.constant 0 : index
    %c0_9 = arith.constant 0 : index
    %14 = vector.load %arg5[%c0_8, %c0_9] : memref<8x32xbf16, #tpu.memory_space<vmem>>, vector<8x32xbf16>
    tpu.vector_store %arg5[%c0_8, %c0_9], %13 {strides = array<i32>} : memref<8x32xbf16, #tpu.memory_space<vmem>>, vector<8x32xbf16>,
    %15 = vector.extract_strided_slice %6 {offsets = [0, 64], sizes = [8, 32], strides = [1, 1]} : vector<8x96xf32> to vector<8x32xf32>
    %16 = arith.truncf %15 : vector<8x32xf32> to vector<8x32xbf16>
    %c0_10 = arith.constant 0 : index
    %c0_11 = arith.constant 0 : index
    %17 = vector.load %arg6[%c0_10, %c0_11] : memref<8x32xbf16, #tpu.memory_space<vmem>>, vector<8x32xbf16>
    tpu.vector_store %arg6[%c0_10, %c0_11], %16 {strides = array<i32>} : memref<8x32xbf16, #tpu.memory_space<vmem>>, vector<8x32xbf16>,
    return
  }
  func.func @transform_0(%arg0: i32) -> (i32, i32) {
    %c0_i32 = arith.constant 0 : i32
    %c0_i32_0 = arith.constant 0 : i32
    return %arg0, %c0_i32 : i32, i32
  }
  func.func @transform_1(%arg0: i32) -> (i32, i32) {
    %c0_i32 = arith.constant 0 : i32
    %c0_i32_0 = arith.constant 0 : i32
    %c0_i32_1 = arith.constant 0 : i32
    return %c0_i32, %c0_i32_0 : i32, i32
  }
  func.func @transform_2(%arg0: i32) -> (i32, i32) {
    %c0_i32 = arith.constant 0 : i32
    %c0_i32_0 = arith.constant 0 : i32
    %c0_i32_1 = arith.constant 0 : i32
    return %c0_i32, %c0_i32_0 : i32, i32
  }
  func.func @transform_3(%arg0: i32) -> (i32, i32) {
    %c0_i32 = arith.constant 0 : i32
    %c0_i32_0 = arith.constant 0 : i32
    return %arg0, %c0_i32 : i32, i32
  }
  func.func @transform_4(%arg0: i32) -> (i32, i32) {
    %c0_i32 = arith.constant 0 : i32
    %c0_i32_0 = arith.constant 0 : i32
    return %arg0, %c0_i32 : i32, i32
  }
  func.func @transform_5(%arg0: i32) -> (i32, i32) {
    %c0_i32 = arith.constant 0 : i32
    %c0_i32_0 = arith.constant 0 : i32
    return %arg0, %c0_i32 : i32, i32
  }
}

</mosaic_0001>

<bundles_post_ra>
// kernel: tpu_custom_call.1
= control target key start
LH: loop header
LB: loop body
LE: loop exit
PB: predicated region body
PF: predicated region fallthrough
CT: control target
= control target key end

     0   :  { %11 = vsyncpa [#allocation3], 0  ;;  %s1046_s0 = inlined_call_operand.hbm [shape: f32[16,32], index: 0, kind: input, shape index: {}]   ;;  %s1047_s1 = inlined_call_operand.hbm [shape: bf16[32,96], index: 1, kind: input, shape index: {}]   ;;  %s1048_s2 = inlined_call_operand.vmem [shape: f32[1,96], index: 2, kind: input, shape index: {}]   ;;  %s1049_s3 = inlined_call_operand.hbm [shape: bf16[16,32], index: 3, kind: output, shape index: {0}]   ;;  %s1050_s4 = inlined_call_operand.hbm [shape: bf16[16,32], index: 4, kind: output, shape index: {1}]   ;;  %s1051_s5 = inlined_call_operand.hbm [shape: bf16[16,32], index: 5, kind: output, shape index: {2}]  }
   0x1   :  { %13 = vsyncpa [#allocation3 + $0x1], 0 }
   0x2   :  { %14 = vsyncpa [#allocation6], 0 }
   0x3   :  { %15 = vsyncpa [#allocation4], 0 }
   0x4   :  { %17 = vsyncpa [#allocation4 + $0x1], 0 }
   0x5   :  { %18 = vsyncpa [#allocation9], 0 }
   0x6   :  { %20 = vsyncpa [#allocation9 + $0x1], 0  ;;  %s858_s18 = smov 0   ;;  %s860_s19 = smov 0  }
   0x7   :  { %s862_s20 = smov 0   ;;  %s864_s21 = smov 0  }
   0x8 LB: > { %s188_s24 = sshll.u32 %s1047_s1, 4  ;;  %s882_s25 = sadd.s32 4294967295, %s821_s21   ;;  %s821_s21 = sphi %s864_s21, %s1063_s21   ;;  %s817_s20 = sphi %s862_s20, %s1062_s20   ;;  %s813_s19 = sphi %s860_s19, %s1061_s19   ;;  %s809_s18 = sphi %s858_s18, %s1060_s18   ;;  %s189_s24 = int_to_ptr.hbm [resolvable:$true] %s188_s24 }
   0x9   : > { %p529_p0 = scmp.ge.s32.totalorder %s821_s21, 1  ;;  %p47_p1 = scmp.eq.s32.totalorder %s882_s25, 0 }
   0xa   : > { %p177_p2 = scmp.lt.s32.totalorder %s821_s21, 3  ;;  %s823_s27 = smov [#allocation5]  }
   0xb   : > { %s190_s28 = sshll.u32 %s823_s27, 4  ;;  %s824_s29 = smov 64   ;;  %s191_s28 = int_to_ptr.vmem [resolvable:$true] %s190_s28 }
   0xc   : > { %p887_p3 = pnand %p529_p0, %p177_p2  ;;  %s825_s30 = smov 4  }
   0xd   : > { %s1052_s6 = sadd.s32 4294967294, %s821_s21   ;;  %s898_s7 = sadd.s32 1, %s821_s21  }
   0xe   : > { %p571_p4 = pneg %p887_p3  ;;  %s33_s8 = sadd.s32 1, %s817_s20 }
   0xf   : > { %s30_s9 = ssub.s32 %s821_s21, %s898_s7  ;;  %p40_p7 = scmp.ne.s32.totalorder %s817_s20, %s813_s19 }
  0x10   : > { %p572_p6 = pnand %p571_p4, %p47_p1  ;;  %p31_p8 = scmp.eq.s32.totalorder %s30_s9, 0 }
  0x11   : > { %p41_p9 = scmp.eq.s32.totalorder %s821_s21, 0  ;;  %p46_p10 = scmp.ne.s32.totalorder %s813_s19, %s809_s18 }
  0x12   : > { %574 = dma.hbm_to_vmem [thread:$0]  (!%p572_p6), %s189_s24, 256, %s191_s28, [#allocation6], %s824_s29, %s824_s29, %s825_s30  }
  0x13   : > { %p112_p11 = scmp.eq.s32.totalorder %s882_s25, 1  ;;  %p914_p12 = por %p47_p1, %p46_p10 }
  0x14   : > { %s910_s10 = scalar_select %p31_p8, %s817_s20, %s33_s8  }
  0x15   : > { %p918_p13 = por %p112_p11, %p40_p7  ;;  %p118_p0 = scmp.eq.s32.totalorder %s1052_s6, 1 }
  0x16   : > { %p42_p2 = por %p41_p9, %p40_p7  ;;  %s207_s13 = sand.u32 1, %s817_s20  }
  0x17   : > { %p925_p4 = por %p118_p0, %p46_p10  ;;  %p590_p6 = scmp.lt.s32.totalorder %s821_s21, 2 }
  0x18   : > { %s532_s15 = sshll.u32 %s207_s13, 3  ;;  %s533_s16 = sshll.u32 %s821_s21, 3 }
  0x19   : > { %s215_s23 = scalar_lea.hbm %s1046_s0, %s533_s16  ;;  %s211_s27 = scalar_lea.vmem [#allocation2], %s532_s15 }
  0x1a   : > { %s217_s24 = sshll.u32 %s215_s23, 4  ;;  %s219_s28 = sshll.u32 %s211_s27, 4  ;;  %s218_s24 = int_to_ptr.hbm [resolvable:$true] %s217_s24  ;;  %s220_s28 = int_to_ptr.vmem [resolvable:$true] %s219_s28 }
  0x1b   : > { %p934_p8 = pnand %p590_p6, %p42_p2  ;;  %s208_s30 = scalar_lea.sflag [#allocation3], %s207_s13 }
  0x1c   : > { %s661_s8 = sshra.s32 %s218_s24, 4  ;;  %s668_s15 = scalar_lea.hbm %s1046_s0, 16  ;;  %s662_s8 = int_to_ptr.hbm [resolvable:$true] %s661_s8 }
  0x1d   : > { %s663_s9 = scalar_lea.hbm %s662_s8, 8  ;;  %p665_p9 = pneg %p934_p8 }
  0x1e   : > { %p664_p7 = scmp.ne.s32.totalorder %s662_s8, %s663_s9  ;;  %p669_p0 = scmp.lt.s32.totalorder %s662_s8, %s1046_s0 }
  0x1f   : > { %p670_p2 = scmp.lt.s32.totalorder %s668_s15, %s663_s9 }
  0x20   : > { %p666_p10 = pnand %p665_p9, %p664_p7 }
  0x21   : > { %p671_p6 = por %p670_p2, %p669_p0 }
  0x22   : > { %p667_p11 = pneg %p666_p10 }
  0x24   : > { %p672_p5 = pnand %p671_p6, %p667_p11 }
  0x26   : > { %675 = shalt.err (!%p672_p5)
}
  0x27   : > { %578 = dma.hbm_to_vmem [thread:$0]  (!%p934_p8), %s218_s24, 128, %s220_s28, %s208_s30  }
  0x28   : > { %228 = sbr.rel (%p887_p3) target bundleno = 317 (0x13d), region = 32  ;;  %s951_s13 = sand.u32 (!%p887_p3), 1, %s813_s19  }
  0x29   : > { %s535_s27 = sshll.u32 (!%p887_p3), %s951_s13, 3  ;;  %s231_s16 = scalar_lea.sflag (!%p887_p3), [#allocation3], %s951_s13 }
  0x2a   : > { %s234_s17 = scalar_lea.vmem (!%p887_p3), [#allocation2], %s535_s27 }
  0x2d   : > { %792 = dma.done.wait (%p914_p12), %s231_s16, 128  }
  0x2e   : > { %794 = vsyncadd (%p914_p12), %s231_s16, 4294967168 }
  0x2f   : > { %796 = dma.done.wait (%p47_p1), [#allocation6], 256  }
  0x30   : > { %798 = vsyncadd (%p47_p1), [#allocation6], 4294967040  ;;  %v558_v0 = vld [vmem:[#allocation5 + $0x8] sm:$0xff]  ;;  %v557_v1 = vld [vmem:[#allocation5] sm:$0xff]  ;;  %vm300_vm0 = vcmask 261120   ;;  %s967_s11 = sshll.u32 %s951_s13, 2 }
  0x31   : > { %310 = vmatpush.bf16.msra.mxu0 %v558_v0  ;;  %v278_v2 = vld [vmem:[%s234_s17] sm:$0xff]  ;;  %s970_s28 = sshll.u32 %s882_s25, 2  ;;  %s262_s9 = scalar_lea.vmem [#allocation7], %s967_s11  ;;  %vm319_vm1 = vcmask 257024  }
  0x32   : > { %v279_v3 = vpack.c.bf16 %v278_v2, %v278_v2  ;;  %v630_v4 = vld [vmem:[%s1048_s2] ss:$0 sm:$0xff]  ;;  %s352_s8 = scalar_lea.hbm %s1049_s3, %s970_s28  ;;  %s354_s15 = sshll.u32 %s262_s9, 4  ;;  %s355_s15 = int_to_ptr.vmem [resolvable:$true] %s354_s15 }
  0x33   : > { %s356_s22 = sshll.u32 %s352_s8, 4  ;;  %s826_s23 = smov 96   ;;  %s357_s22 = int_to_ptr.hbm [resolvable:$true] %s356_s22 }
  0x34   : > { %s332_s27 = scalar_lea.sflag [#allocation4], %s951_s13  ;;  %s705_s16 = sshra.s32 %s357_s22, 4  ;;  %s706_s16 = int_to_ptr.hbm [resolvable:$true] %s705_s16 }
  0x35   : > { %311 = vmatpush.bf16.msra.mxu0 %v557_v1  ;;  %s707_s17 = scalar_lea.hbm %s706_s16, 4  ;;  %s711_s29 = scalar_lea.hbm %s1049_s3, 8 }
  0x36   : > { %p708_p1 = scmp.ne.s32.totalorder %s706_s16, %s707_s17  ;;  %p712_p12 = scmp.lt.s32.totalorder %s706_s16, %s1049_s3 }
  0x37   : > { %p713_p8 = scmp.lt.s32.totalorder %s711_s29, %s707_s17 }
  0x38   : > { %548 = vmatmul.msk.bf16.vlgmr.msra.gmra.mxu0 %vm300_vm0, %v279_v3  ;;  %p709_p3 = pnand %p708_p1, %p918_p13 }
  0x39   : > { %p714_p7 = por %p713_p8, %p712_p12 }
  0x3a   : > { %p710_p5 = pneg %p709_p3 }
  0x3c   : > { %p715_p9 = pnand %p714_p7, %p710_p5 }
  0xb5   : > { %v313_v5 = vpop.f32.mrf.mxu0 }
  0xb6   : > { %v314_v6 = vadd.f32 %v630_v4, %v313_v5 }
  0xb8   : > { %v317_v7 = vmul.f32 0.35355338, %v314_v6  ;;  %v321_v8 = vpack.c.bf16 %v314_v6, %v314_v6 }
  0xba   : > { %v318_v9 = vpack.c.bf16 %v317_v7, %v317_v7  ;;  %323 = vrot.lane.b32.xlu0 %v321_v8, %s826_s23 }
  0xbc   : > { %320 = vst.msk [vmem:[%s262_s9] sm:$0xf] %vm319_vm1, %v318_v9 }
  0xbd   : > { %v315_v10 = vpop.f32.mrf.mxu0 }
  0xbe   : > { %718 = shalt.err (!%p715_p9)
}
  0xbf   : > { %565 = dma.vmem_to_hbm [thread:$0]  (%p918_p13), %s355_s15, 64, %s357_s22, %s332_s27  }
  0xc0   : > { %s827_s13 = smov 64   ;;  %s366_s26 = scalar_lea.hbm %s1050_s4, %s970_s28 }
  0xc1   : > { %s336_s24 = sand.u32 1, %s882_s25   ;;  %s269_s16 = scalar_lea.vmem [#allocation8], %s967_s11 }
  0xc2   : > { %327 = vrot.lane.b32.xlu0 %v321_v8, %s827_s13  ;;  %s368_s17 = sshll.u32 %s269_s16, 4  ;;  %s370_s29 = sshll.u32 %s366_s26, 4  ;;  %s369_s17 = int_to_ptr.vmem [resolvable:$true] %s368_s17  ;;  %s371_s29 = int_to_ptr.hbm [resolvable:$true] %s370_s29 }
  0xc3   : > { %s380_s15 = scalar_lea.hbm %s1051_s5, %s970_s28  ;;  %s1000_s22 = scalar_lea.sflag [#allocation9], %s336_s24 }
  0xc4   : > { %s733_s27 = sshra.s32 %s371_s29, 4  ;;  %s739_s23 = scalar_lea.hbm %s1050_s4, 8  ;;  %s734_s27 = int_to_ptr.hbm [resolvable:$true] %s733_s27 }
  0xc5   : > { %s735_s13 = scalar_lea.hbm %s734_s27, 4  ;;  %p740_p2 = scmp.lt.s32.totalorder %s734_s27, %s1050_s4 }
  0xc6   : > { %p736_p10 = scmp.ne.s32.totalorder %s734_s27, %s735_s13  ;;  %p741_p6 = scmp.lt.s32.totalorder %s739_s23, %s735_s13 }
  0xc8   : > { %p737_p11 = pnand %p736_p10, %p918_p13  ;;  %p742_p1 = por %p741_p6, %p740_p2 }
  0xca   : > { %p738_p0 = pneg %p737_p11 }
  0xcc   : > { %p743_p3 = pnand %p742_p1, %p738_p0 }
 0x12c   : > { %v324_v11 = vpop.permute.xlu0 %323 }
 0x12d   : > { %326 = vst.msk [vmem:[%s269_s16] sm:$0xf] %vm319_vm1, %v324_v11 }
 0x12e   : > { %746 = shalt.err (!%p743_p3)
}
 0x12f   : > { %566 = dma.vmem_to_hbm [thread:$0]  (%p918_p13), %s369_s17, 64, %s371_s29, %s1000_s22  }
 0x130   : > { %s276_s28 = scalar_lea.vmem [#allocation10], %s967_s11  ;;  %s384_s16 = sshll.u32 %s380_s15, 4  ;;  %s385_s16 = int_to_ptr.hbm [resolvable:$true] %s384_s16 }
 0x131   : > { %s382_s24 = sshll.u32 %s276_s28, 4  ;;  %s761_s6 = sshra.s32 %s385_s16, 4  ;;  %s383_s24 = int_to_ptr.vmem [resolvable:$true] %s382_s24  ;;  %s762_s6 = int_to_ptr.hbm [resolvable:$true] %s761_s6 }
 0x132   : > { %s763_s30 = scalar_lea.hbm %s762_s6, 4  ;;  %s767_s13 = scalar_lea.hbm %s1051_s5, 8 }
 0x133   : > { %p764_p5 = scmp.ne.s32.totalorder %s762_s6, %s763_s30  ;;  %p768_p7 = scmp.lt.s32.totalorder %s762_s6, %s1051_s5 }
 0x134   : > { %v328_v12 = vpop.permute.xlu0 %327  ;;  %p769_p9 = scmp.lt.s32.totalorder %s767_s13, %s763_s30 }
 0x135   : > { %330 = vst.msk [vmem:[%s276_s28] sm:$0xf] %vm319_vm1, %v328_v12  ;;  %p765_p12 = pnand %p764_p5, %p918_p13 }
 0x136   : > { %p770_p10 = por %p769_p9, %p768_p7 }
 0x137   : > { %p766_p8 = pneg %p765_p12 }
 0x139   : > { %p771_p11 = pnand %p770_p10, %p766_p8 }
 0x13b   : > { %774 = shalt.err (!%p771_p11)
}
 0x13c   : > { %567 = dma.vmem_to_hbm [thread:$0]  (%p918_p13), %s383_s24, 64, %s385_s16, %s1000_s22  }
 0x13d PF: > { %s396_s29 = sand.u32 1, %s809_s18   ;;  %p1058_p0 = scmp.ge.s32.totalorder %s821_s21, 2 }
 0x13e   : > { %s397_s15 = scalar_lea.sflag [#allocation4], %s396_s29 }
 0x13f   : > { %p580_p2 = pnand %p1058_p0, %p925_p4 }
 0x141   : > { %p581_p6 = pneg %p580_p2 }
 0x143   : > { %800 = dma.done.wait (%p581_p6), %s397_s15, 64  }
 0x144   : > { %802 = vsyncadd (%p581_p6), %s397_s15, 4294967232  ;;  %s1059_s25 = sadd.s32 4294967294, %s821_s21  }
 0x145   : > { %s406_s9 = sand.u32 1, %s1059_s25  }
 0x146   : > { %s407_s23 = scalar_lea.sflag [#allocation9], %s406_s9 }
 0x147   : > { %804 = dma.done.wait (%p581_p6), %s407_s23, 128  }
 0x148   : > { %806 = vsyncadd (%p581_p6), %s407_s23, 4294967168  ;;  %p23_p13 = scmp.ge.s32.totalorder %s898_s7, 4   ;;  %s1060_s18 = smov %s813_s19 }
 0x149   : > { %s1061_s19 = smov %s817_s20  ;;  %s1062_s20 = smov %s910_s10 }
 0x14a   : > { %s1063_s21 = smov %s898_s7  ;;  %25 = sbr.rel (!%p23_p13) target bundleno = 8 (0x8), region = 113 }
 0x14f   :  { %423 = vsyncpa [#allocation3], 1 }
 0x150   :  { %425 = vsyncpa [#allocation3 + $0x1], 1 }
 0x151   :  { %426 = vsyncpa [#allocation6], 1 }
 0x152   :  { %427 = vsyncpa [#allocation4], 1 }
 0x153   :  { %429 = vsyncpa [#allocation4 + $0x1], 1 }
 0x154   :  { %430 = vsyncpa [#allocation9], 1 }
 0x155   :  { %432 = vsyncpa [#allocation9 + $0x1], 1 }

</bundles_post_ra>
